<compile_context>
chip_gen: v7x
topology: tpu7x:2x2x1
jax: 0.10.0
libtpu: 0.0.40
codegen_flags: <defaults>
</compile_context>

<pallas_src>
import jax
import jax.numpy as jnp
from jax.experimental import pallas as pl
from jax.experimental.pallas import tpu as pltpu

WINDOW_SIZE = 24
IN_FEATURES = WINDOW_SIZE * 8   # 192
HIDDEN = 64
OUT_FEATURES = 7
PAD_OUT = 8                     # fc3 padded to 8 lanes (narrow, cheap writeback)
MAX_TILE_B = 2048               # ~5 MiB double-buffered VMEM; safe on v5e/v6e/v7x


def fnn_kernel(x_ref, w1_ref, b1_ref, w2_ref, b2_ref, w3_ref, b3_ref, o_ref):
    # Cast x to bf16 in-kernel (VPU work hidden under the input DMA pipeline).
    x = x_ref[...].astype(jnp.bfloat16)
    # fc1 + ReLU  (bf16 operands, f32 MXU accumulation)
    h1 = jnp.dot(x, w1_ref[...], preferred_element_type=jnp.float32)
    h1 = jnp.maximum(h1 + b1_ref[...], 0.0)
    # fc2 + ReLU
    h2 = jnp.dot(h1.astype(jnp.bfloat16), w2_ref[...],
                 preferred_element_type=jnp.float32)
    h2 = jnp.maximum(h2 + b2_ref[...], 0.0)
    # fc3 (column 7 is a zero-padded weight/bias column; sliced off outside)
    out = jnp.dot(h2.astype(jnp.bfloat16), w3_ref[...],
                  preferred_element_type=jnp.float32)
    o_ref[...] = (out + b3_ref[...]).astype(o_ref.dtype)


def _choose_tile_b(batch):
    """Sublane-aligned (multiple of 8) batch tile; keep >=2 and even grid steps
    so the parallel axis load-balances across v7x's two TensorCores."""
    if batch <= 8:
        return 8
    nb = pl.cdiv(batch, MAX_TILE_B)
    if nb == 1:
        nb = 2
    elif nb % 2:
        nb += 1
    return max(8, ((pl.cdiv(batch, nb) + 7) // 8) * 8)


def prepare_params(params):
    """One-time param prep (off the per-call path): bf16 weights for the MXU,
    fc3 weight/bias zero-padded from 7 to PAD_OUT=8 output columns."""
    w1, b1, w2, b2, w3, b3 = params
    w1b = w1.astype(jnp.bfloat16)
    w2b = w2.astype(jnp.bfloat16)
    w3p = jnp.zeros((HIDDEN, PAD_OUT), jnp.bfloat16)
    w3p = w3p.at[:, :OUT_FEATURES].set(w3.astype(jnp.bfloat16))
    b3p = jnp.zeros((1, PAD_OUT), jnp.float32).at[:, :OUT_FEATURES].set(b3)
    return (w1b, b1.astype(jnp.float32), w2b, b2.astype(jnp.float32), w3p, b3p)


def fnn_forward(x, prep):
    """x: (B, window_size, 8) or (B, window_size*8), float. Returns (B, 7) float32."""
    w1b, b1, w2b, b2, w3p, b3p = prep
    B = x.shape[0]
    x2d = x.reshape(B, -1)                      # x.view(x.size(0), -1); no cast/pad here

    tile_b = _choose_tile_b(B)
    nb = pl.cdiv(B, tile_b)

    x_item = jnp.dtype(x2d.dtype).itemsize
    flops = 2 * B * (IN_FEATURES * HIDDEN + HIDDEN * HIDDEN + HIDDEN * PAD_OUT)
    bytes_accessed = (
        B * IN_FEATURES * x_item                                        # x read
        + B * PAD_OUT * 4                                               # out write
        + (IN_FEATURES * HIDDEN + HIDDEN * HIDDEN + HIDDEN * PAD_OUT) * 2
        + (2 * HIDDEN + PAD_OUT) * 4)

    const2d = lambda shape: pl.BlockSpec(shape, lambda i: (0, 0))

    out = pl.pallas_call(
        fnn_kernel,
        out_shape=jax.ShapeDtypeStruct((B, PAD_OUT), jnp.float32),
        grid=(nb,),
        in_specs=[
            pl.BlockSpec((tile_b, IN_FEATURES), lambda i: (i, 0)),   # streamed x
            const2d(w1b.shape), const2d(b1.shape),                   # VMEM-resident params
            const2d(w2b.shape), const2d(b2.shape),
            const2d(w3p.shape), const2d(b3p.shape),
        ],
        out_specs=pl.BlockSpec((tile_b, PAD_OUT), lambda i: (i, 0)),
        compiler_params=pltpu.CompilerParams(
            dimension_semantics=("parallel",),
            vmem_limit_bytes=32 << 20),
        cost_estimate=pl.CostEstimate(
            flops=flops, transcendentals=0, bytes_accessed=bytes_accessed),
    )(x2d, w1b, b1, w2b, b2, w3p, b3p)

    return out[:, :OUT_FEATURES]


def init_params(key):
    """Deterministic init mimicking nn.Linear's uniform(-1/sqrt(fan_in), ...).
    Weights stored transposed vs PyTorch: (in_features, out_features)."""
    ks = jax.random.split(key, 6)

    def linear(kw, kb, fan_in, fan_out):
        bound = 1.0 / jnp.sqrt(jnp.float32(fan_in))
        w = jax.random.uniform(kw, (fan_in, fan_out), jnp.float32, -bound, bound)
        b = jax.random.uniform(kb, (1, fan_out), jnp.float32, -bound, bound)
        return w, b

    w1, b1 = linear(ks[0], ks[1], IN_FEATURES, HIDDEN)
    w2, b2 = linear(ks[2], ks[3], HIDDEN, HIDDEN)
    w3, b3 = linear(ks[4], ks[5], HIDDEN, OUT_FEATURES)
    return (w1, b1, w2, b2, w3, b3)


def fnn_reference(x, params):
    w1, b1, w2, b2, w3, b3 = params
    h = x.reshape(x.shape[0], -1).astype(jnp.float32)
    h = jnp.maximum(h @ w1 + b1, 0.0)
    h = jnp.maximum(h @ w2 + b2, 0.0)
    return h @ w3 + b3


if __name__ == "__main__":
    key = jax.random.PRNGKey(0)
    k_x, k_p, k_x2 = jax.random.split(key, 3)
    params = init_params(k_p)
    prep = prepare_params(params)   # one-time weight prep (hoisted out of forward)

    # Small test (B=2): single grid step, partial (edge-clipped) batch block.
    B = 2
    x = jax.random.normal(k_x, (B, WINDOW_SIZE, 8), jnp.float32)
    out = jax.block_until_ready(fnn_forward(x, prep))
    ref = fnn_reference(x, params)
    assert out.shape == (B, OUT_FEATURES)
    assert jnp.allclose(out, ref, atol=5e-2, rtol=5e-2), "mismatch (B=2) vs reference"

    # Larger test: ragged batch, 2 balanced grid steps, partial last block clipped.
    B2 = 2051
    x2 = jax.random.normal(k_x2, (B2, WINDOW_SIZE, 8), jnp.float32)
    out2 = jax.block_until_ready(fnn_forward(x2, prep))
    ref2 = fnn_reference(x2, params)
    assert out2.shape == (B2, OUT_FEATURES)
    assert jnp.allclose(out2, ref2, atol=5e-2, rtol=5e-2), "mismatch (B=2051) vs reference"

    print("KERNEL_OK")
</pallas_src>

<mosaic_0001>
module attributes {stable_mosaic.version = 11 : i64} {
  func.func @fnn_kernel(%arg0: i32, %arg1: memref<8x192xf32, #tpu.memory_space<vmem>>, %arg2: memref<192x64xbf16, #tpu.memory_space<vmem>>, %arg3: memref<1x64xf32, #tpu.memory_space<vmem>>, %arg4: memref<64x64xbf16, #tpu.memory_space<vmem>>, %arg5: memref<1x64xf32, #tpu.memory_space<vmem>>, %arg6: memref<64x8xbf16, #tpu.memory_space<vmem>>, %arg7: memref<1x8xf32, #tpu.memory_space<vmem>>, %arg8: memref<8x8xf32, #tpu.memory_space<vmem>>) attributes {dimension_semantics = [#tpu.dimension_semantics<parallel>], iteration_bounds = array<i64: 1>, scalar_prefetch = 0 : i64, scratch_operands = 0 : i64, tpu.core_type = #tpu.core_type<tc>, window_params = [{transform_indices = @transform_0, window_bounds = array<i64: 8, 192>}, {pipeline_mode = #tpu.pipeline_mode<synchronous>, transform_indices = @transform_1, window_bounds = array<i64: 192, 64>}, {pipeline_mode = #tpu.pipeline_mode<synchronous>, transform_indices = @transform_2, window_bounds = array<i64: 1, 64>}, {pipeline_mode = #tpu.pipeline_mode<synchronous>, transform_indices = @transform_3, window_bounds = array<i64: 64, 64>}, {pipeline_mode = #tpu.pipeline_mode<synchronous>, transform_indices = @transform_4, window_bounds = array<i64: 1, 64>}, {pipeline_mode = #tpu.pipeline_mode<synchronous>, transform_indices = @transform_5, window_bounds = array<i64: 64, 8>}, {pipeline_mode = #tpu.pipeline_mode<synchronous>, transform_indices = @transform_6, window_bounds = array<i64: 1, 8>}, {transform_indices = @transform_7, window_bounds = array<i64: 8, 8>}]} {
    %c0 = arith.constant 0 : index
    %c0_0 = arith.constant 0 : index
    %0 = vector.load %arg1[%c0, %c0_0] : memref<8x192xf32, #tpu.memory_space<vmem>>, vector<8x192xf32>
    %1 = arith.truncf %0 : vector<8x192xf32> to vector<8x192xbf16>
    %c0_1 = arith.constant 0 : index
    %c0_2 = arith.constant 0 : index
    %2 = vector.load %arg2[%c0_1, %c0_2] : memref<192x64xbf16, #tpu.memory_space<vmem>>, vector<192x64xbf16>
    %cst = arith.constant dense<0.000000e+00> : vector<8x64xf32>
    %3 = tpu.matmul %1, %2, %cst {dimension_numbers = #tpu.dot_dimension_numbers<[1], [0], [0], [1], [0, 0, 1, 1], [], []>} : vector<8x192xbf16>, vector<192x64xbf16>, vector<8x64xf32> -> vector<8x64xf32>
    %c0_3 = arith.constant 0 : index
    %c0_4 = arith.constant 0 : index
    %4 = vector.load %arg3[%c0_3, %c0_4] : memref<1x64xf32, #tpu.memory_space<vmem>>, vector<1x64xf32>
    %5 = vector.broadcast %4 : vector<1x64xf32> to vector<8x64xf32>
    %6 = arith.addf %3, %5 : vector<8x64xf32>
    %cst_5 = arith.constant 0.000000e+00 : f32
    %7 = vector.broadcast %cst_5 : f32 to vector<8x64xf32>
    %8 = arith.maximumf %6, %7 : vector<8x64xf32>
    %9 = arith.truncf %8 : vector<8x64xf32> to vector<8x64xbf16>
    %c0_6 = arith.constant 0 : index
    %c0_7 = arith.constant 0 : index
    %10 = vector.load %arg4[%c0_6, %c0_7] : memref<64x64xbf16, #tpu.memory_space<vmem>>, vector<64x64xbf16>
    %cst_8 = arith.constant dense<0.000000e+00> : vector<8x64xf32>
    %11 = tpu.matmul %9, %10, %cst_8 {dimension_numbers = #tpu.dot_dimension_numbers<[1], [0], [0], [1], [0, 0, 1, 1], [], []>} : vector<8x64xbf16>, vector<64x64xbf16>, vector<8x64xf32> -> vector<8x64xf32>
    %c0_9 = arith.constant 0 : index
    %c0_10 = arith.constant 0 : index
    %12 = vector.load %arg5[%c0_9, %c0_10] : memref<1x64xf32, #tpu.memory_space<vmem>>, vector<1x64xf32>
    %13 = vector.broadcast %12 : vector<1x64xf32> to vector<8x64xf32>
    %14 = arith.addf %11, %13 : vector<8x64xf32>
    %cst_11 = arith.constant 0.000000e+00 : f32
    %15 = vector.broadcast %cst_11 : f32 to vector<8x64xf32>
    %16 = arith.maximumf %14, %15 : vector<8x64xf32>
    %17 = arith.truncf %16 : vector<8x64xf32> to vector<8x64xbf16>
    %c0_12 = arith.constant 0 : index
    %c0_13 = arith.constant 0 : index
    %18 = vector.load %arg6[%c0_12, %c0_13] : memref<64x8xbf16, #tpu.memory_space<vmem>>, vector<64x8xbf16>
    %cst_14 = arith.constant dense<0.000000e+00> : vector<8x8xf32>
    %19 = tpu.matmul %17, %18, %cst_14 {dimension_numbers = #tpu.dot_dimension_numbers<[1], [0], [0], [1], [0, 0, 1, 1], [], []>} : vector<8x64xbf16>, vector<64x8xbf16>, vector<8x8xf32> -> vector<8x8xf32>
    %c0_15 = arith.constant 0 : index
    %c0_16 = arith.constant 0 : index
    %20 = vector.load %arg7[%c0_15, %c0_16] : memref<1x8xf32, #tpu.memory_space<vmem>>, vector<1x8xf32>
    %21 = vector.broadcast %20 : vector<1x8xf32> to vector<8x8xf32>
    %22 = arith.addf %19, %21 : vector<8x8xf32>
    %c0_17 = arith.constant 0 : index
    %c0_18 = arith.constant 0 : index
    %23 = vector.load %arg8[%c0_17, %c0_18] : memref<8x8xf32, #tpu.memory_space<vmem>>, vector<8x8xf32>
    tpu.vector_store %arg8[%c0_17, %c0_18], %22 {strides = array<i32>} : memref<8x8xf32, #tpu.memory_space<vmem>>, vector<8x8xf32>,
    return
  }
  func.func @transform_0(%arg0: i32) -> (i32, i32) {
    %c0_i32 = arith.constant 0 : i32
    %c0_i32_0 = arith.constant 0 : i32
    return %arg0, %c0_i32 : i32, i32
  }
  func.func @transform_1(%arg0: i32) -> (i32, i32) {
    %c0_i32 = arith.constant 0 : i32
    %c0_i32_0 = arith.constant 0 : i32
    %c0_i32_1 = arith.constant 0 : i32
    return %c0_i32, %c0_i32_0 : i32, i32
  }
  func.func @transform_2(%arg0: i32) -> (i32, i32) {
    %c0_i32 = arith.constant 0 : i32
    %c0_i32_0 = arith.constant 0 : i32
    %c0_i32_1 = arith.constant 0 : i32
    return %c0_i32, %c0_i32_0 : i32, i32
  }
  func.func @transform_3(%arg0: i32) -> (i32, i32) {
    %c0_i32 = arith.constant 0 : i32
    %c0_i32_0 = arith.constant 0 : i32
    %c0_i32_1 = arith.constant 0 : i32
    return %c0_i32, %c0_i32_0 : i32, i32
  }
  func.func @transform_4(%arg0: i32) -> (i32, i32) {
    %c0_i32 = arith.constant 0 : i32
    %c0_i32_0 = arith.constant 0 : i32
    %c0_i32_1 = arith.constant 0 : i32
    return %c0_i32, %c0_i32_0 : i32, i32
  }
  func.func @transform_5(%arg0: i32) -> (i32, i32) {
    %c0_i32 = arith.constant 0 : i32
    %c0_i32_0 = arith.constant 0 : i32
    %c0_i32_1 = arith.constant 0 : i32
    return %c0_i32, %c0_i32_0 : i32, i32
  }
  func.func @transform_6(%arg0: i32) -> (i32, i32) {
    %c0_i32 = arith.constant 0 : i32
    %c0_i32_0 = arith.constant 0 : i32
    %c0_i32_1 = arith.constant 0 : i32
    return %c0_i32, %c0_i32_0 : i32, i32
  }
  func.func @transform_7(%arg0: i32) -> (i32, i32) {
    %c0_i32 = arith.constant 0 : i32
    %c0_i32_0 = arith.constant 0 : i32
    return %arg0, %c0_i32 : i32, i32
  }
}

</mosaic_0001>

<bundles_post_ra>
// kernel: tpu_custom_call.1
= control target key start
LH: loop header
LB: loop body
LE: loop exit
PB: predicated region body
PF: predicated region fallthrough
CT: control target
= control target key end

     0   :  { %12 = vsyncpa [#allocation3], 0  ;;  %v506_v1 = vmov 0   ;;  %v507_v3 = vmov 0.0   ;;  %vm161_vm0 = vcmask 523264   ;;  %vm508_vm1 = vmmov 0   ;;  %s652_s0 = inlined_call_operand.vmem [shape: f32[2,192], index: 0, kind: input, shape index: {}]   ;;  %s653_s1 = inlined_call_operand.vmem [shape: bf16[192,64], index: 1, kind: input, shape index: {}]   ;;  %s654_s2 = inlined_call_operand.vmem [shape: f32[1,64], index: 2, kind: input, shape index: {}]   ;;  %s655_s3 = inlined_call_operand.vmem [shape: bf16[64,64], index: 3, kind: input, shape index: {}]   ;;  %s656_s4 = inlined_call_operand.vmem [shape: f32[1,64], index: 4, kind: input, shape index: {}]   ;;  %s657_s5 = inlined_call_operand.vmem [shape: bf16[64,8], index: 5, kind: input, shape index: {}]   ;;  %s658_s6 = inlined_call_operand.vmem [shape: f32[1,8], index: 6, kind: input, shape index: {}]   ;;  %s659_s7 = inlined_call_operand.hbm [shape: f32[2,8], index: 7, kind: output, shape index: {}]  }
   0x1   :  { %v458_v0 = vld [vmem:[%s653_s1] sm:$0xff]   ;;  %165 = vmatprep.subr.bf16.mxu0 %v506_v1  ;;  %v459_v2 = vld [vmem:[%s653_s1 + $0x8] sm:$0xff]   ;;  %427 = vmatprep.subr.bf16.mxu1 %v507_v3  ;;  %v460_v4 = vld [vmem:[%s653_s1 + $0x10] sm:$0xff]   ;;  %vm373_vm2 = vcmask 64512  }
   0x2   :  { %166 = vmatpush1.bf16.msra.mxu0 %v458_v0  ;;  %v461_v5 = vld [vmem:[%s653_s1 + $0x18] sm:$0xff]   ;;  %v462_v6 = vld [vmem:[%s653_s1 + $0x20] sm:$0xff]   ;;  %v463_v9 = vld [vmem:[%s653_s1 + $0x28] sm:$0xff]   ;;  %435 = vmatprep.mubr.msk.bf16.mxu1 %vm508_vm1, %v507_v3 }
   0x3   :  { %167 = vmatprep.subr.bf16.mxu0 %v506_v1  ;;  %v472_v7 = vld [vmem:[%s655_s3] sm:$0xff]   ;;  %v481_v10 = vld.sshfl [vmem:[%s652_s0 + $0x8] sm:$0xff pattern:$0x76325410]  ;;  %v464_v12 = vld [vmem:[%s653_s1 + $0x30] sm:$0xff]  }
   0x4   :  { %v480_v8 = vld.sshfl [vmem:[%s652_s0] sm:$0xff pattern:$0x76325410]  ;;  %428 = vmatpush3.bf16.msra.mxu1 %v472_v7  ;;  %v473_v11 = vld [vmem:[%s655_s3 + $0x8] sm:$0xff]   ;;  %v465_v15 = vld [vmem:[%s653_s1 + $0x38] sm:$0xff]  }
   0x5   :  { %429 = vmatprep.subr.bf16.mxu1 %v507_v3  ;;  %v53_v13 = vcombine.high %v480_v8, %v481_v10  ;;  %v466_v16 = vld [vmem:[%s653_s1 + $0x40] sm:$0xff]   ;;  %v467_v17 = vld [vmem:[%s653_s1 + $0x48] sm:$0xff]   ;;  %v468_v18 = vld [vmem:[%s653_s1 + $0x50] sm:$0xff]   ;;  %v52_v19 = vcombine.low %v480_v8, %v481_v10 }
   0x6   :  { %168 = vmatpush1.bf16.msra.mxu0 %v459_v2  ;;  %v469_v20 = vld [vmem:[%s653_s1 + $0x58] sm:$0xff]   ;;  %v474_v22 = vld [vmem:[%s655_s3 + $0x10] sm:$0xff]   ;;  %v391_v24 = vld [vmem:[%s654_s2] ss:$0 sm:$0xff] }
   0x7   :  { %169 = vmatprep.subr.bf16.mxu0 %v506_v1  ;;  %v57_v14 = vpack.c.bf16 %v53_v13, %v53_v13  ;;  %v56_v21 = vpack.c.bf16 %v52_v19, %v52_v19  ;;  %v475_v23 = vld [vmem:[%s655_s3 + $0x18] sm:$0xff]   ;;  %v476_v31 = vld [vmem:[%s657_s5] sm:$0xff]   ;;  %v477_v33 = vld [vmem:[%s657_s5 + $0x8] sm:$0xff]  }
   0x8   :  { %430 = vmatpush3.bf16.msra.mxu1 %v473_v11  ;;  %v478_v34 = vld [vmem:[%s657_s5 + $0x10] sm:$0xff]   ;;  %v479_v35 = vld [vmem:[%s657_s5 + $0x18] sm:$0xff]   ;;  %v405_v36 = vld [vmem:[%s656_s4] ss:$0 sm:$0xff] }
   0x9   :  { %431 = vmatprep.subr.bf16.mxu1 %v507_v3  ;;  %404 = vmatprep.mubr.msk.bf16.mxu0 %vm161_vm0, %v57_v14  ;;  %v411_v44 = vld [vmem:[%s658_s6] ss:$0 sm:$0xff] }
   0xa   :  { %170 = vmatpush1.bf16.msra.mxu0 %v460_v4 }
   0xb   :  { %171 = vmatprep.subr.bf16.mxu0 %v506_v1 }
   0xc   :  { %432 = vmatpush3.bf16.msra.mxu1 %v474_v22 }
   0xd   :  { %433 = vmatprep.subr.bf16.mxu1 %v507_v3 }
   0xe   :  { %172 = vmatpush1.bf16.msra.mxu0 %v461_v5 }
   0xf   :  { %173 = vmatprep.subr.bf16.mxu0 %v506_v1 }
  0x10   :  { %434 = vmatpush3.bf16.msra.mxu1 %v475_v23 }
  0x11   :  { %439 = vmatprep.subr.bf16.mxu1 %v507_v3 }
  0x12   :  { %174 = vmatpush1.bf16.msra.mxu0 %v462_v6 }
  0x13   :  { %175 = vmatprep.subr.bf16.mxu0 %v506_v1 }
  0x16   :  { %176 = vmatpush1.bf16.msra.mxu0 %v463_v9 }
  0x17   :  { %177 = vmatprep.subr.bf16.mxu0 %v506_v1 }
  0x1a   :  { %178 = vmatpush1.bf16.msra.mxu0 %v464_v12 }
  0x1b   :  { %179 = vmatprep.subr.bf16.mxu0 %v506_v1 }
  0x1e   :  { %180 = vmatpush1.bf16.msra.mxu0 %v465_v15 }
  0x1f   :  { %181 = vmatprep.subr.bf16.mxu0 %v506_v1 }
  0x22   :  { %182 = vmatpush1.bf16.msra.mxu0 %v466_v16 }
  0x23   :  { %183 = vmatprep.subr.bf16.mxu0 %v506_v1 }
  0x26   :  { %184 = vmatpush1.bf16.msra.mxu0 %v467_v17 }
  0x27   :  { %185 = vmatprep.subr.bf16.mxu0 %v506_v1 }
  0x2a   :  { %186 = vmatpush1.bf16.msra.mxu0 %v468_v18 }
  0x2b   :  { %187 = vmatprep.subr.bf16.mxu0 %v506_v1 }
  0x2e   :  { %188 = vmatpush1.bf16.msra.mxu0 %v469_v20 }
  0x31   :  { %198 = vmatmul.mubr.bf16.vlgmr.msra.gmra.mrb[0].mxu0 %v56_v21 }
 0x104   :  { %v199_v25 = vpop.f32.mrb[0].mxu0 }
 0x105   :  { %v200_v26 = vadd.f32 %v391_v24, %v199_v25  ;;  %v201_v27 = vpop.f32.mrb[1].mxu0 }
 0x106   :  { %v202_v28 = vpop.f32.mrb[2].mxu0 }
 0x107   :  { %v205_v29 = vmax.f32 %v200_v26, 0.0  ;;  %v203_v30 = vpop.f32.mrb[3].mxu0 }
 0x109   :  { %v206_v32 = vpack.c.bf16 %v205_v29, %v205_v29 }
 0x10b   :  { %436 = vmatmul.mubr.msk.bf16.vlgmr.msra.gmra.mrb[0].mxu1 %vm161_vm0, %v206_v32 }
 0x10c   :  { %440 = vmatpush3.bf16.msra.mxu1 %v476_v31  ;;  %447 = vmatprep.mubr.msk.bf16.mxu1 %vm508_vm1, %v507_v3 }
 0x10d   :  { %441 = vmatprep.subr.bf16.mxu1 %v507_v3 }
 0x110   :  { %442 = vmatpush3.bf16.msra.mxu1 %v477_v33 }
 0x111   :  { %443 = vmatprep.subr.bf16.mxu1 %v507_v3 }
 0x114   :  { %444 = vmatpush3.bf16.msra.mxu1 %v478_v34 }
 0x115   :  { %445 = vmatprep.subr.bf16.mxu1 %v507_v3 }
 0x118   :  { %446 = vmatpush3.bf16.msra.mxu1 %v479_v35 }
 0x1de   :  { %v283_v37 = vpop.f32.mrb[0].mxu1 }
 0x1df   :  { %v284_v38 = vadd.f32 %v405_v36, %v283_v37  ;;  %v437_v39 = vpop.f32.mrb[1].mxu1 }
 0x1e0   :  { %v286_v40 = vpop.f32.mrb[2].mxu1 }
 0x1e1   :  { %v289_v41 = vmax.f32 %v284_v38, 0.0  ;;  %v438_v42 = vpop.f32.mrb[3].mxu1 }
 0x1e3   :  { %v290_v43 = vpack.c.bf16 %v289_v41, %v289_v41 }
 0x1e5   :  { %448 = vmatmul.mubr.msk.bf16.vlgmr.msra.gmra.mrb[4].mxu1 %vm161_vm0, %v290_v43 }
 0x2b8   :  { %v367_v45 = vpop.f32.mrb[4].mxu1 }
 0x2b9   :  { %v368_v46 = vadd.f32 %v411_v44, %v367_v45  ;;  %v449_v47 = vpop.f32.mrb[5].mxu1 }
 0x2ba   :  { %v370_v48 = vpop.f32.mrb[6].mxu1 }
 0x2bb   :  { %374 = vst.msk [vmem:[#allocation2] sm:$0xff] %vm373_vm2, %v368_v46  ;;  %v450_v49 = vpop.f32.mrb[7].mxu1 }
 0x2bc   :  { %379 = vsyncadd [#allocation3], 96  ;;  %s509_s4 = smov [#allocation2]  }
 0x2bd   :  { %s380_s5 = sshll.u32 %s509_s4, 4  ;;  %s381_s5 = int_to_ptr.vmem [resolvable:$true] %s380_s5 }
 0x2be   :  { %s482_s23 = scalar_lea.vmem %s381_s5, 32  ;;  %s486_s24 = scalar_lea.vmem %s381_s5, 128 }
 0x2bf   :  { %p483_p0 = scmp.ne.s32.totalorder %s381_s5, %s482_s23  ;;  %p487_p1 = scmp.lt.s32.totalorder %s381_s5, %s381_s5 }
 0x2c0   :  { %p488_p2 = scmp.lt.s32.totalorder %s486_s24, %s482_s23 }
 0x2c2   :  { %p489_p3 = por %p488_p2, %p487_p1 }
 0x2c4   :  { %p490_p4 = pnand %p489_p3, %p483_p0 }
 0x2c6   :  { %493 = shalt.err (!%p490_p4)
}
 0x2c7   :  { %s494_s26 = scalar_lea.hbm %s659_s7, 32 }
 0x2c8   :  { %p495_p5 = scmp.ne.s32.totalorder %s659_s7, %s494_s26  ;;  %p498_p6 = scmp.lt.u32.totalorder %s494_s26, %s659_s7 }
 0x2ca   :  { %p500_p7 = pnand %p498_p6, %p495_p5 }
 0x2cc   :  { %503 = shalt.err (!%p500_p7)
}
 0x2cd   :  { %s510_s8 = smov 32   ;;  %s511_s9 = smov 2  }
 0x2ce   :  { %386 = dma.vmem_to_hbm [thread:$0]  %s381_s5, 32, %s659_s7, [#allocation3], %s510_s8, %s510_s8, %s511_s9  }
 0x2cf   :  { %504 = dma.done.wait [#allocation3], 128  }
 0x2d0   :  { %505 = vsyncadd [#allocation3], 4294967168 }
 0x2d1   :  { %390 = vsyncpa [#allocation3], 1 }

</bundles_post_ra>
